<compile_context>
chip_gen: v7x
topology: tpu7x:2x2x1
jax: 0.10.0
libtpu: 0.0.40
codegen_flags: <defaults>
</compile_context>

<pallas_src>
import jax
import jax.numpy as jnp
from jax.experimental import pallas as pl
from jax.experimental.pallas import tpu as pltpu


def _round_up(n, m):
    return ((n + m - 1) // m) * m


def _qnet_kernel(x_ref, a_ref, w1x_ref, w1a_ref, b1_ref, w2_ref, b2_ref,
                 w3_ref, b3_ref, out_ref):
    """One batch tile: 2-layer ReLU MLP + scalar head, fully in VMEM."""
    # Layer 1: split-K bf16 matmul replaces cat([x, a], 1) @ W1 (f32 accum).
    h1 = jnp.dot(x_ref[...], w1x_ref[...], preferred_element_type=jnp.float32)
    h1 = h1 + jnp.dot(a_ref[...], w1a_ref[...],
                      preferred_element_type=jnp.float32)
    h1 = jnp.maximum(h1 + b1_ref[...], 0.0)                      # (TB, H1) f32

    # Layer 2: bf16 MXU matmul, bias-add + ReLU in f32 (safe on v5e VPU).
    h2 = jnp.dot(h1.astype(jnp.bfloat16), w2_ref[...],
                 preferred_element_type=jnp.float32)
    h2 = jnp.maximum(h2 + b2_ref[...], 0.0)                      # (TB, H2) f32

    # Output head (H2 -> 1): f32 VPU multiply + lane (XLU) reduction (keeps
    # the MXU free, avoids a 1-column matmul wasting 127/255 output columns).
    q = jnp.sum(h2 * w3_ref[...], axis=-1, keepdims=True)        # (TB, 1)
    out_ref[...] = q + b3_ref[...]


def qnetwork_forward(x, a, params, *, tb=None):
    """Pallas-backed QNetwork forward.

    x: (B, obs_dim), a: (B, act_dim)
    params: dict with w1 (obs_dim+act_dim, H1), b1 (1, H1),
            w2 (H1, H2), b2 (1, H2), w3 (H2, 1), b3 (1, 1)   (all f32)
    returns: (B, 1) f32
    """
    x = x.astype(jnp.float32)
    a = a.astype(jnp.float32)
    B, obs_dim = x.shape
    _, act_dim = a.shape

    w1, b1 = params["w1"], params["b1"]
    w2, b2 = params["w2"], params["b2"]
    w3, b3 = params["w3"], params["b3"]
    h1_dim, h2_dim = w1.shape[1], w2.shape[1]
    d_in = obs_dim + act_dim

    # MXU operands in bf16 (native MXU path, halves weight/activation DMA);
    # biases, head weights and all accumulation stay f32.
    w1x = w1[:obs_dim].astype(jnp.bfloat16)        # (obs_dim, H1)
    w1a = w1[obs_dim:].astype(jnp.bfloat16)        # (act_dim, H1)
    w2b = w2.astype(jnp.bfloat16)                  # (H1, H2)
    b1 = b1.astype(jnp.float32)
    b2 = b2.astype(jnp.float32)
    b3 = b3.astype(jnp.float32)
    w3_row = w3.reshape(1, h2_dim).astype(jnp.float32)   # broadcast row (VPU head)
    x = x.astype(jnp.bfloat16)
    a = a.astype(jnp.bfloat16)

    # Batch tile: multiple of 128 (MXU M / vreg alignment).  When B > 128,
    # force >= 2 grid steps so the "parallel" axis can shard across the two
    # v7x TensorCores; cap at 1024 to amortize per-step overhead.
    if tb is None:
        tb = _round_up(pl.cdiv(B, 2), 128) if B > 128 else 128
        tb = min(tb, 1024)
    tb = max(128, _round_up(tb, 128))
    num_tiles = pl.cdiv(B, tb)
    b_pad = num_tiles * tb
    if b_pad != B:
        # Padded rows compute garbage q values; they are sliced off below.
        x = jnp.pad(x, ((0, b_pad - B), (0, 0)))
        a = jnp.pad(a, ((0, b_pad - B), (0, 0)))

    def tiled(feat):
        # Streamed activation tile: block over batch, full (narrow) feature dim.
        return pl.BlockSpec((tb, feat), lambda i: (i, 0))

    def resident(arr):
        # Whole array, constant block index -> stays VMEM-resident across
        # grid steps (never re-DMAed).  pl.Buffered(1) single-buffering would
        # shave ~0.3 MB of idle double-buffer but is left off to stay on the
        # default, proven lowering path.
        return pl.BlockSpec(arr.shape, lambda i: (0, 0))

    flops = 2 * b_pad * (d_in * h1_dim + h1_dim * h2_dim + h2_dim)
    bytes_accessed = (2 * (b_pad * d_in + d_in * h1_dim + h1_dim * h2_dim)
                      + 4 * (h1_dim + h2_dim + h2_dim + 1 + b_pad))
    cost = pl.CostEstimate(flops=int(flops), transcendentals=0,
                           bytes_accessed=int(bytes_accessed))

    # Rough per-step VMEM footprint; only raise the scoped limit if a very
    # large tb would trip v5e's 16 MiB default.
    vmem_bytes = (2 * 2 * tb * d_in                              # 2x-buffered bf16 x/a
                  + 2 * (d_in * h1_dim + h1_dim * h2_dim)        # bf16 weights
                  + 4 * (h1_dim + h2_dim + h2_dim + 1)           # f32 biases + w3
                  + 4 * tb * (h1_dim + h2_dim)                   # h1/h2 intermediates
                  + 2 * 4 * tb)                                  # 2x-buffered output
    compiler_kwargs = dict(dimension_semantics=("parallel",))
    if vmem_bytes > 12 * 1024 * 1024:
        compiler_kwargs["vmem_limit_bytes"] = int(
            min(2 * vmem_bytes, 64 * 1024 * 1024))

    out = pl.pallas_call(
        _qnet_kernel,
        out_shape=jax.ShapeDtypeStruct((b_pad, 1), jnp.float32),
        grid=(num_tiles,),
        in_specs=[
            tiled(obs_dim),          # x tile
            tiled(act_dim),          # a tile
            resident(w1x), resident(w1a), resident(b1),
            resident(w2b), resident(b2),
            resident(w3_row), resident(b3),
        ],
        out_specs=pl.BlockSpec((tb, 1), lambda i: (i, 0)),
        compiler_params=pltpu.CompilerParams(**compiler_kwargs),
        cost_estimate=cost,
    )(x, a, w1x, w1a, b1, w2b, b2, w3_row, b3)

    return out[:B]


def init_params(key, obs_dim, act_dim, hidden_dims):
    """PyTorch-style uniform init, (in_features, out_features) layout."""
    d_in = obs_dim + act_dim
    dims = [d_in] + list(hidden_dims) + [1]
    params = {}
    for i in range(len(dims) - 1):
        key, kw, kb = jax.random.split(key, 3)
        fan_in, fan_out = dims[i], dims[i + 1]
        bound = 1.0 / jnp.sqrt(jnp.float32(fan_in))
        params[f"w{i + 1}"] = jax.random.uniform(
            kw, (fan_in, fan_out), jnp.float32, -bound, bound)
        params[f"b{i + 1}"] = jax.random.uniform(
            kb, (1, fan_out), jnp.float32, -bound, bound)
    return params


def reference_forward(x, a, params):
    """Pure-JAX f32 reference (matches the PyTorch module exactly)."""
    xa = jnp.concatenate([x, a], axis=1)
    h = jnp.maximum(xa @ params["w1"] + params["b1"], 0.0)
    h = jnp.maximum(h @ params["w2"] + params["b2"], 0.0)
    return h @ params["w3"] + params["b3"]


if __name__ == "__main__":
    # Shapes consistent with the module defaults: hidden_dims=[256, 256],
    # obs_dim=16, act_dim=8.  B=200 with the auto tile (tb=128) exercises
    # both the 2-step batch grid (v7x megacore path) and padded-batch logic.
    B, OBS, ACT = 200, 16, 8
    HIDDEN = [256, 256]

    key = jax.random.PRNGKey(0)
    k_x, k_a, k_p = jax.random.split(key, 3)
    x = jax.random.normal(k_x, (B, OBS), jnp.float32)
    a = jax.random.normal(k_a, (B, ACT), jnp.float32)
    params = init_params(k_p, OBS, ACT, HIDDEN)

    q = qnetwork_forward(x, a, params)
    q = jax.block_until_ready(q)

    q_ref = reference_forward(x, a, params)
    assert q.shape == (B, 1)
    max_err = float(jnp.max(jnp.abs(q - q_ref)))
    # Kernel uses bf16 MXU operands with f32 accumulation, so tolerance vs the
    # pure-f32 reference is loosened accordingly.
    assert jnp.allclose(q, q_ref, atol=5e-2, rtol=5e-2), (
        f"mismatch vs reference, max abs err {max_err}")

    print("KERNEL_OK")
</pallas_src>

<mosaic_0001>
module attributes {stable_mosaic.version = 11 : i64} {
  func.func @_qnet_kernel(%arg0: i32, %arg1: memref<128x16xbf16, #tpu.memory_space<vmem>>, %arg2: memref<128x8xbf16, #tpu.memory_space<vmem>>, %arg3: memref<16x256xbf16, #tpu.memory_space<vmem>>, %arg4: memref<8x256xbf16, #tpu.memory_space<vmem>>, %arg5: memref<1x256xf32, #tpu.memory_space<vmem>>, %arg6: memref<256x256xbf16, #tpu.memory_space<vmem>>, %arg7: memref<1x256xf32, #tpu.memory_space<vmem>>, %arg8: memref<1x256xf32, #tpu.memory_space<vmem>>, %arg9: memref<1x1xf32, #tpu.memory_space<vmem>>, %arg10: memref<128x1xf32, #tpu.memory_space<vmem>>) attributes {dimension_semantics = [#tpu.dimension_semantics<parallel>], iteration_bounds = array<i64: 2>, scalar_prefetch = 0 : i64, scratch_operands = 0 : i64, tpu.core_type = #tpu.core_type<tc>, window_params = [{transform_indices = @transform_0, window_bounds = array<i64: 128, 16>}, {transform_indices = @transform_1, window_bounds = array<i64: 128, 8>}, {pipeline_mode = #tpu.pipeline_mode<synchronous>, transform_indices = @transform_2, window_bounds = array<i64: 16, 256>}, {pipeline_mode = #tpu.pipeline_mode<synchronous>, transform_indices = @transform_3, window_bounds = array<i64: 8, 256>}, {pipeline_mode = #tpu.pipeline_mode<synchronous>, transform_indices = @transform_4, window_bounds = array<i64: 1, 256>}, {pipeline_mode = #tpu.pipeline_mode<synchronous>, transform_indices = @transform_5, window_bounds = array<i64: 256, 256>}, {pipeline_mode = #tpu.pipeline_mode<synchronous>, transform_indices = @transform_6, window_bounds = array<i64: 1, 256>}, {pipeline_mode = #tpu.pipeline_mode<synchronous>, transform_indices = @transform_7, window_bounds = array<i64: 1, 256>}, {pipeline_mode = #tpu.pipeline_mode<synchronous>, transform_indices = @transform_8, window_bounds = array<i64: 1, 1>}, {transform_indices = @transform_9, window_bounds = array<i64: 128, 1>}]} {
    %c0 = arith.constant 0 : index
    %c0_0 = arith.constant 0 : index
    %0 = vector.load %arg1[%c0, %c0_0] : memref<128x16xbf16, #tpu.memory_space<vmem>>, vector<128x16xbf16>
    %c0_1 = arith.constant 0 : index
    %c0_2 = arith.constant 0 : index
    %1 = vector.load %arg3[%c0_1, %c0_2] : memref<16x256xbf16, #tpu.memory_space<vmem>>, vector<16x256xbf16>
    %cst = arith.constant dense<0.000000e+00> : vector<128x256xf32>
    %2 = tpu.matmul %0, %1, %cst {dimension_numbers = #tpu.dot_dimension_numbers<[1], [0], [0], [1], [0, 0, 1, 1], [], []>} : vector<128x16xbf16>, vector<16x256xbf16>, vector<128x256xf32> -> vector<128x256xf32>
    %c0_3 = arith.constant 0 : index
    %c0_4 = arith.constant 0 : index
    %3 = vector.load %arg2[%c0_3, %c0_4] : memref<128x8xbf16, #tpu.memory_space<vmem>>, vector<128x8xbf16>
    %c0_5 = arith.constant 0 : index
    %c0_6 = arith.constant 0 : index
    %4 = vector.load %arg4[%c0_5, %c0_6] : memref<8x256xbf16, #tpu.memory_space<vmem>>, vector<8x256xbf16>
    %cst_7 = arith.constant dense<0.000000e+00> : vector<128x256xf32>
    %5 = tpu.matmul %3, %4, %cst_7 {dimension_numbers = #tpu.dot_dimension_numbers<[1], [0], [0], [1], [0, 0, 1, 1], [], []>} : vector<128x8xbf16>, vector<8x256xbf16>, vector<128x256xf32> -> vector<128x256xf32>
    %6 = arith.addf %2, %5 : vector<128x256xf32>
    %c0_8 = arith.constant 0 : index
    %c0_9 = arith.constant 0 : index
    %7 = vector.load %arg5[%c0_8, %c0_9] : memref<1x256xf32, #tpu.memory_space<vmem>>, vector<1x256xf32>
    %8 = vector.broadcast %7 : vector<1x256xf32> to vector<128x256xf32>
    %9 = arith.addf %6, %8 : vector<128x256xf32>
    %cst_10 = arith.constant 0.000000e+00 : f32
    %10 = vector.broadcast %cst_10 : f32 to vector<128x256xf32>
    %11 = arith.maximumf %9, %10 : vector<128x256xf32>
    %12 = arith.truncf %11 : vector<128x256xf32> to vector<128x256xbf16>
    %c0_11 = arith.constant 0 : index
    %c0_12 = arith.constant 0 : index
    %13 = vector.load %arg6[%c0_11, %c0_12] : memref<256x256xbf16, #tpu.memory_space<vmem>>, vector<256x256xbf16>
    %cst_13 = arith.constant dense<0.000000e+00> : vector<128x256xf32>
    %14 = tpu.matmul %12, %13, %cst_13 {dimension_numbers = #tpu.dot_dimension_numbers<[1], [0], [0], [1], [0, 0, 1, 1], [], []>} : vector<128x256xbf16>, vector<256x256xbf16>, vector<128x256xf32> -> vector<128x256xf32>
    %c0_14 = arith.constant 0 : index
    %c0_15 = arith.constant 0 : index
    %15 = vector.load %arg7[%c0_14, %c0_15] : memref<1x256xf32, #tpu.memory_space<vmem>>, vector<1x256xf32>
    %16 = vector.broadcast %15 : vector<1x256xf32> to vector<128x256xf32>
    %17 = arith.addf %14, %16 : vector<128x256xf32>
    %cst_16 = arith.constant 0.000000e+00 : f32
    %18 = vector.broadcast %cst_16 : f32 to vector<128x256xf32>
    %19 = arith.maximumf %17, %18 : vector<128x256xf32>
    %c0_17 = arith.constant 0 : index
    %c0_18 = arith.constant 0 : index
    %20 = vector.load %arg8[%c0_17, %c0_18] : memref<1x256xf32, #tpu.memory_space<vmem>>, vector<1x256xf32>
    %21 = vector.broadcast %20 : vector<1x256xf32> to vector<128x256xf32>
    %22 = arith.mulf %19, %21 : vector<128x256xf32>
    %cst_19 = arith.constant dense<0.000000e+00> : vector<128xf32>
    %23 = vector.multi_reduction <add>, %22, %cst_19 [1] : vector<128x256xf32> to vector<128xf32>
    %24 = vector.shape_cast %23 : vector<128xf32> to vector<128x1xf32>
    %c0_20 = arith.constant 0 : index
    %c0_21 = arith.constant 0 : index
    %25 = vector.load %arg9[%c0_20, %c0_21] : memref<1x1xf32, #tpu.memory_space<vmem>>, vector<1x1xf32>
    %26 = vector.broadcast %25 : vector<1x1xf32> to vector<128x1xf32>
    %27 = arith.addf %24, %26 : vector<128x1xf32>
    %c0_22 = arith.constant 0 : index
    %c0_23 = arith.constant 0 : index
    %28 = vector.load %arg10[%c0_22, %c0_23] : memref<128x1xf32, #tpu.memory_space<vmem>>, vector<128x1xf32>
    tpu.vector_store %arg10[%c0_22, %c0_23], %27 {strides = array<i32>} : memref<128x1xf32, #tpu.memory_space<vmem>>, vector<128x1xf32>,
    return
  }
  func.func @transform_0(%arg0: i32) -> (i32, i32) {
    %c0_i32 = arith.constant 0 : i32
    %c0_i32_0 = arith.constant 0 : i32
    return %arg0, %c0_i32 : i32, i32
  }
  func.func @transform_1(%arg0: i32) -> (i32, i32) {
    %c0_i32 = arith.constant 0 : i32
    %c0_i32_0 = arith.constant 0 : i32
    return %arg0, %c0_i32 : i32, i32
  }
  func.func @transform_2(%arg0: i32) -> (i32, i32) {
    %c0_i32 = arith.constant 0 : i32
    %c0_i32_0 = arith.constant 0 : i32
    %c0_i32_1 = arith.constant 0 : i32
    return %c0_i32, %c0_i32_0 : i32, i32
  }
  func.func @transform_3(%arg0: i32) -> (i32, i32) {
    %c0_i32 = arith.constant 0 : i32
    %c0_i32_0 = arith.constant 0 : i32
    %c0_i32_1 = arith.constant 0 : i32
    return %c0_i32, %c0_i32_0 : i32, i32
  }
  func.func @transform_4(%arg0: i32) -> (i32, i32) {
    %c0_i32 = arith.constant 0 : i32
    %c0_i32_0 = arith.constant 0 : i32
    %c0_i32_1 = arith.constant 0 : i32
    return %c0_i32, %c0_i32_0 : i32, i32
  }
  func.func @transform_5(%arg0: i32) -> (i32, i32) {
    %c0_i32 = arith.constant 0 : i32
    %c0_i32_0 = arith.constant 0 : i32
    %c0_i32_1 = arith.constant 0 : i32
    return %c0_i32, %c0_i32_0 : i32, i32
  }
  func.func @transform_6(%arg0: i32) -> (i32, i32) {
    %c0_i32 = arith.constant 0 : i32
    %c0_i32_0 = arith.constant 0 : i32
    %c0_i32_1 = arith.constant 0 : i32
    return %c0_i32, %c0_i32_0 : i32, i32
  }
  func.func @transform_7(%arg0: i32) -> (i32, i32) {
    %c0_i32 = arith.constant 0 : i32
    %c0_i32_0 = arith.constant 0 : i32
    %c0_i32_1 = arith.constant 0 : i32
    return %c0_i32, %c0_i32_0 : i32, i32
  }
  func.func @transform_8(%arg0: i32) -> (i32, i32) {
    %c0_i32 = arith.constant 0 : i32
    %c0_i32_0 = arith.constant 0 : i32
    %c0_i32_1 = arith.constant 0 : i32
    return %c0_i32, %c0_i32_0 : i32, i32
  }
  func.func @transform_9(%arg0: i32) -> (i32, i32) {
    %c0_i32 = arith.constant 0 : i32
    %c0_i32_0 = arith.constant 0 : i32
    return %arg0, %c0_i32 : i32, i32
  }
}

</mosaic_0001>

<bundles_post_ra>
// kernel: tpu_custom_call.1
= control target key start
LH: loop header
LB: loop body
LE: loop exit
PB: predicated region body
PF: predicated region fallthrough
CT: control target
= control target key end

     0   :  { %s1670_s11 = smov 0   ;;  %s2012_s0 = inlined_call_operand.vmem [shape: bf16[256,16], index: 0, kind: input, shape index: {}]   ;;  %s2013_s1 = inlined_call_operand.vmem [shape: bf16[256,8], index: 1, kind: input, shape index: {}]   ;;  %s2014_s2 = inlined_call_operand.vmem [shape: bf16[16,256], index: 2, kind: input, shape index: {}]   ;;  %s2015_s3 = inlined_call_operand.vmem [shape: bf16[8,256], index: 3, kind: input, shape index: {}]   ;;  %s2016_s4 = inlined_call_operand.vmem [shape: f32[1,256], index: 4, kind: input, shape index: {}]   ;;  %s2017_s5 = inlined_call_operand.vmem [shape: bf16[256,256], index: 5, kind: input, shape index: {}]   ;;  %s2018_s6 = inlined_call_operand.vmem [shape: f32[1,256], index: 6, kind: input, shape index: {}]   ;;  %s2019_s7 = inlined_call_operand.vmem [shape: f32[1,256], index: 7, kind: input, shape index: {}]   ;;  %s2020_s8 = inlined_call_operand.<no memory space> [shape: f32[1,1], index: 8, kind: input, shape index: {}]   ;;  %s2021_s9 = inlined_call_operand.vmem [shape: f32[256,1], index: 9, kind: output, shape index: {}]  }
   0x1   :  { %v14_v0 = vstv %s2020_s8 }
   0x2   :  { %15 = vst [vmem:[#allocation2] sm:$0x1] %v14_v0 }
   0x3 LB: > { %s1415_s12 = sadd.s32 4294967295, %s1614_s11   ;;  %p1419_p0 = scmp.ge.s32.totalorder %s1614_s11, 1  ;;  %s1614_s11 = sphi %s1670_s11, %s21_s11  }
   0x4   : > { %p301_p1 = scmp.lt.s32.totalorder %s1614_s11, 3 }
   0x6   : > { %p302_p2 = pnand %p1419_p0, %p301_p1 }
   0x7   : > { %v395_v1 = vld [vmem:[%s2015_s3] sm:$0xff] (!%p302_p2)  ;;  %vm466_vm0 = vcmask (!%p302_p2), 1043456   ;;  %s1420_s8 = sshll.u32 (!%p302_p2), %s1415_s12, 4  ;;  %v1616_v4 = vmov (!%p302_p2), 0   ;;  %v1563_v9 = vld [vmem:[%s2017_s5 + $0x14] ss:$8 sps:$4 sm:$0xff] (!%p302_p2)   ;;  %v776_v56 = vlaneseq (!%p302_p2) }
   0x8   : > { %305 = sbr.rel (%p302_p2) target bundleno = 729 (0x2d9), region = 56  ;;  %v1435_v2 = vcombine.high (!%p302_p2), %v395_v1, %v395_v1  ;;  %v1434_v3 = vcombine.low (!%p302_p2), %v395_v1, %v395_v1  ;;  %505 = vmatprep.mubr.bf16.mxu0 (!%p302_p2), %v1616_v4  ;;  %v1543_v5 = vld [vmem:[%s2014_s2 + $0x4] ss:$8 sps:$4 sm:$0xff] (!%p302_p2)   ;;  %p343_p3 = scmp.lt.s32.totalorder (!%p302_p2), %s1420_s8, 31  ;;  %v1562_v8 = vld [vmem:[%s2017_s5] ss:$8 sps:$4 sm:$0xff] (!%p302_p2)  }
   0x9   : > { %v1560_v6 = vld [vmem:[%s2017_s5 + $0x4] ss:$8 sps:$4 sm:$0xff] (!%p302_p2)   ;;  %v1541_v10 = vld [vmem:[%s2014_s2] ss:$8 sps:$4 sm:$0xff] (!%p302_p2)   ;;  %v1565_v11 = vld [vmem:[%s2017_s5 + $0x10] ss:$8 sps:$4 sm:$0xff] (!%p302_p2)  }
   0xa   : > { %1436 = vmatprep.subr.msk.bf16.mxu0 (!%p302_p2), %vm466_vm0, %v1435_v2  ;;  %v468_v7 = vsel (!%p302_p2), %vm466_vm0, %v1434_v3, 0  ;;  %1070 = vmatprep.subr.bf16.mxu1 (!%p302_p2), %v1560_v6  ;;  %vm441_vm1 = vcmask (!%p302_p2), 64512   ;;  %v1566_v12 = vld [vmem:[%s2017_s5 + $0x24] ss:$8 sps:$4 sm:$0xff] (!%p302_p2)   ;;  %v1568_v14 = vld [vmem:[%s2017_s5 + $0x20] ss:$8 sps:$4 sm:$0xff] (!%p302_p2)  }
   0xb   : > { %474 = vmatpush1.bf16.msra.mxu0 (!%p302_p2), %v468_v7  ;;  %1071 = vmatpush1.bf16.msra.mxu1 (!%p302_p2), %v1562_v8  ;;  %v1569_v15 = vld [vmem:[%s2017_s5 + $0x34] ss:$8 sps:$4 sm:$0xff] (!%p302_p2)   ;;  %v1571_v18 = vld [vmem:[%s2017_s5 + $0x30] ss:$8 sps:$4 sm:$0xff] (!%p302_p2)   ;;  %v1572_v19 = vld [vmem:[%s2017_s5 + $0x44] ss:$8 sps:$4 sm:$0xff] (!%p302_p2)  }
   0xc   : > { %661 = vmatprep.subr.bf16.mxu0 (!%p302_p2), %v1543_v5  ;;  %1072 = vmatprep.subr.bf16.mxu1 (!%p302_p2), %v1563_v9  ;;  %v1574_v20 = vld [vmem:[%s2017_s5 + $0x40] ss:$8 sps:$4 sm:$0xff] (!%p302_p2)   ;;  %v1575_v21 = vld [vmem:[%s2017_s5 + $0x54] ss:$8 sps:$4 sm:$0xff] (!%p302_p2)   ;;  %v1577_v23 = vld [vmem:[%s2017_s5 + $0x50] ss:$8 sps:$4 sm:$0xff] (!%p302_p2)  }
   0xd   : > { %v1578_v24 = vld [vmem:[%s2017_s5 + $0x64] ss:$8 sps:$4 sm:$0xff] (!%p302_p2)   ;;  %v1580_v25 = vld [vmem:[%s2017_s5 + $0x60] ss:$8 sps:$4 sm:$0xff] (!%p302_p2)   ;;  %v1581_v26 = vld [vmem:[%s2017_s5 + $0x74] ss:$8 sps:$4 sm:$0xff] (!%p302_p2)  }
   0xe   : > { %v1583_v28 = vld [vmem:[%s2017_s5 + $0x70] ss:$8 sps:$4 sm:$0xff] (!%p302_p2)   ;;  %v1584_v29 = vld [vmem:[%s2017_s5 + $0x84] ss:$8 sps:$4 sm:$0xff] (!%p302_p2)   ;;  %v1586_v30 = vld [vmem:[%s2017_s5 + $0x80] ss:$8 sps:$4 sm:$0xff] (!%p302_p2)  }
   0xf   : > { %s2023_s8 = smov (!%p343_p3, %s1420_s8), 31  ;;  %1073 = vmatpush1.bf16.msra.mxu1 %v1565_v11  ;;  %v1587_v31 = vld [vmem:[%s2017_s5 + $0x94] ss:$8 sps:$4 sm:$0xff]   ;;  %v1589_v33 = vld [vmem:[%s2017_s5 + $0x90] ss:$8 sps:$4 sm:$0xff]   ;;  %vm636_vm2 = vcmask 130048  }
  0x10   : > { %s1421_s25 = sshll.u32 %s2023_s8, 2  ;;  %1074 = vmatprep.subr.bf16.mxu1 %v1566_v12  ;;  %v1590_v34 = vld [vmem:[%s2017_s5 + $0xa4] ss:$8 sps:$4 sm:$0xff]   ;;  %v1592_v35 = vld [vmem:[%s2017_s5 + $0xa0] ss:$8 sps:$4 sm:$0xff]   ;;  %v777_v57 = vshrl.u32 %v776_v56, 7 }
  0x11   : > { %s1706_s30 = scalar_lea.vmem %s2013_s1, %s1421_s25  ;;  %s1724_s19 = scalar_lea.vmem %s2012_s0, %s1421_s25  ;;  %v1593_v36 = vld [vmem:[%s2017_s5 + $0xb4] ss:$8 sps:$4 sm:$0xff]   ;;  %v1595_v38 = vld [vmem:[%s2017_s5 + $0xb0] ss:$8 sps:$4 sm:$0xff]   ;;  %v1596_v39 = vld [vmem:[%s2017_s5 + $0xc4] ss:$8 sps:$4 sm:$0xff]  }
  0x12   : > { %v1544_v13 = vld [vmem:[%s1706_s30] sm:$0xff]   ;;  %v1545_v16 = vld [vmem:[%s1706_s30 + $0x8] sm:$0xff]   ;;  %v1546_v17 = vld [vmem:[%s1706_s30 + $0x10] sm:$0xff]   ;;  %v1844_v58 = vsub.s32 0, %v777_v57  ;;  %v1849_v60 = vsub.s32 1, %v777_v57  ;;  %s1425_s20 = sshll.u32 %s2023_s8, 3 }
  0x13   : > { %1437 = vmatmul.mubr.msk.bf16.vlgmr.msra.gmra.mrb[0].mxu0 %vm441_vm1, %v1544_v13  ;;  %1075 = vmatpush1.bf16.msra.mxu1 %v1568_v14  ;;  %v1547_v22 = vld [vmem:[%s1706_s30 + $0x18] sm:$0xff]   ;;  %v1548_v27 = vld [vmem:[%s1706_s30 + $0x20] sm:$0xff]   ;;  %v1549_v32 = vld [vmem:[%s1706_s30 + $0x28] sm:$0xff]   ;;  %s1975_s23 = scalar_lea.vmem %s2021_s9, %s1425_s20  ;;  %vm1330_vm3 = vcmask 7168  }
  0x14   : > { %662 = vmatpush1.bf16.msra.mxu0 %v1541_v10  ;;  %515 = vmatprep.mubr.bf16.mxu0 %v1616_v4  ;;  %v1550_v37 = vld [vmem:[%s1706_s30 + $0x30] sm:$0xff]   ;;  %v1598_v40 = vld [vmem:[%s2017_s5 + $0xc0] ss:$8 sps:$4 sm:$0xff]   ;;  %v1551_v42 = vld [vmem:[%s1706_s30 + $0x38] sm:$0xff]  }
  0x15   : > { %1076 = vmatprep.subr.bf16.mxu1 %v1569_v15  ;;  %v1599_v41 = vld [vmem:[%s2017_s5 + $0xd4] ss:$8 sps:$4 sm:$0xff]   ;;  %v1552_v43 = vld [vmem:[%s1724_s19] sm:$0xff]   ;;  %v1553_v44 = vld [vmem:[%s1724_s19 + $0x8] sm:$0xff]  }
  0x16   : > { %v1554_v45 = vld [vmem:[%s1724_s19 + $0x10] sm:$0xff]   ;;  %v1555_v46 = vld [vmem:[%s1724_s19 + $0x18] sm:$0xff]   ;;  %v1556_v47 = vld [vmem:[%s1724_s19 + $0x20] sm:$0xff]  }
  0x17   : > { %1077 = vmatpush1.bf16.msra.mxu1 %v1571_v18  ;;  %v1557_v48 = vld [vmem:[%s1724_s19 + $0x28] sm:$0xff]   ;;  %v1558_v49 = vld [vmem:[%s1724_s19 + $0x30] sm:$0xff]   ;;  %v1559_v50 = vld [vmem:[%s1724_s19 + $0x38] sm:$0xff]  }
  0x18   : > { %1078 = vmatprep.subr.bf16.mxu1 %v1572_v19  ;;  %v1601_v51 = vld [vmem:[%s2017_s5 + $0xd0] ss:$8 sps:$4 sm:$0xff]   ;;  %v1602_v52 = vld [vmem:[%s2017_s5 + $0xe4] ss:$8 sps:$4 sm:$0xff]   ;;  %v1604_v53 = vld [vmem:[%s2017_s5 + $0xe0] ss:$8 sps:$4 sm:$0xff]  }
  0x19   : > { %v1605_v54 = vld [vmem:[%s2017_s5 + $0xf4] ss:$8 sps:$4 sm:$0xff]   ;;  %v1607_v55 = vld [vmem:[%s2017_s5 + $0xf0] ss:$8 sps:$4 sm:$0xff]   ;;  %v774_v59 = vld [vmem:[%s2016_s4] sm:$0x3] }
  0x1a   : > { %v1852_v61 = vrot.slane %v774_v59, %v1844_v58  ;;  %v1855_v62 = vrot.slane %v774_v59, %v1849_v60 }
  0x1b   : > { %1438 = vmatmul.mubr.msk.bf16.gmra.mrb[4].mxu0 %vm441_vm1, %v1545_v16  ;;  %1079 = vmatpush1.bf16.msra.mxu1 %v1574_v20 }
  0x1c   : > { %525 = vmatprep.mubr.bf16.mxu0 %v1616_v4  ;;  %1080 = vmatprep.subr.bf16.mxu1 %v1575_v21 }
  0x1f   : > { %1081 = vmatpush1.bf16.msra.mxu1 %v1577_v23 }
  0x20   : > { %1082 = vmatprep.subr.bf16.mxu1 %v1578_v24 }
  0x23   : > { %1439 = vmatmul.mubr.msk.bf16.gmra.mrb[8].mxu0 %vm441_vm1, %v1546_v17  ;;  %1083 = vmatpush1.bf16.msra.mxu1 %v1580_v25 }
  0x24   : > { %535 = vmatprep.mubr.bf16.mxu0 %v1616_v4  ;;  %1084 = vmatprep.subr.bf16.mxu1 %v1581_v26 }
  0x27   : > { %1085 = vmatpush1.bf16.msra.mxu1 %v1583_v28 }
  0x28   : > { %1086 = vmatprep.subr.bf16.mxu1 %v1584_v29 }
  0x2b   : > { %1440 = vmatmul.mubr.msk.bf16.gmra.mrb[12].mxu0 %vm441_vm1, %v1547_v22  ;;  %1087 = vmatpush1.bf16.msra.mxu1 %v1586_v30 }
  0x2c   : > { %545 = vmatprep.mubr.bf16.mxu0 %v1616_v4  ;;  %1088 = vmatprep.subr.bf16.mxu1 %v1587_v31 }
  0x2f   : > { %1089 = vmatpush1.bf16.msra.mxu1 %v1589_v33 }
  0x30   : > { %1090 = vmatprep.subr.bf16.mxu1 %v1590_v34 }
  0x33   : > { %1441 = vmatmul.mubr.msk.bf16.gmra.mrb[16].mxu0 %vm441_vm1, %v1548_v27  ;;  %1091 = vmatpush1.bf16.msra.mxu1 %v1592_v35 }
  0x34   : > { %555 = vmatprep.mubr.bf16.mxu0 %v1616_v4  ;;  %1092 = vmatprep.subr.bf16.mxu1 %v1593_v36 }
  0x37   : > { %1093 = vmatpush1.bf16.msra.mxu1 %v1595_v38 }
  0x38   : > { %1094 = vmatprep.subr.bf16.mxu1 %v1596_v39 }
  0x3b   : > { %1442 = vmatmul.mubr.msk.bf16.gmra.mrb[20].mxu0 %vm441_vm1, %v1549_v32  ;;  %1095 = vmatpush1.bf16.msra.mxu1 %v1598_v40 }
  0x3c   : > { %565 = vmatprep.mubr.bf16.mxu0 %v1616_v4  ;;  %1096 = vmatprep.subr.bf16.mxu1 %v1599_v41 }
  0x3f   : > { %1097 = vmatpush1.bf16.msra.mxu1 %v1601_v51 }
  0x40   : > { %1098 = vmatprep.subr.bf16.mxu1 %v1602_v52 }
  0x43   : > { %1443 = vmatmul.mubr.msk.bf16.gmra.mrb[24].mxu0 %vm441_vm1, %v1550_v37  ;;  %1099 = vmatpush1.bf16.msra.mxu1 %v1604_v53 }
  0x44   : > { %575 = vmatprep.mubr.bf16.mxu0 %v1616_v4  ;;  %1100 = vmatprep.subr.bf16.mxu1 %v1605_v54 }
  0x47   : > { %1101 = vmatpush1.bf16.msra.mxu1 %v1607_v55 }
  0x4b   : > { %1444 = vmatmul.mubr.msk.bf16.gmra.mrb[28].mxu0 %vm441_vm1, %v1551_v42 }
  0x4c   : > { %693 = vmatprep.mubr.bf16.mxu0 %v1616_v4 }
  0x53   : > { %1455 = vmatmul.mubr.msk.bf16.vlgmr.msra.gmra.mrb[0].mxu0 %vm636_vm2, %v1552_v43 }
  0x54   : > { %703 = vmatprep.mubr.bf16.mxu0 %v1616_v4 }
  0x5b   : > { %1456 = vmatmul.mubr.msk.bf16.gmra.mrb[4].mxu0 %vm636_vm2, %v1553_v44 }
  0x5c   : > { %713 = vmatprep.mubr.bf16.mxu0 %v1616_v4 }
  0x63   : > { %1457 = vmatmul.mubr.msk.bf16.gmra.mrb[8].mxu0 %vm636_vm2, %v1554_v45 }
  0x64   : > { %723 = vmatprep.mubr.bf16.mxu0 %v1616_v4 }
  0x6b   : > { %1458 = vmatmul.mubr.msk.bf16.gmra.mrb[12].mxu0 %vm636_vm2, %v1555_v46 }
  0x6c   : > { %733 = vmatprep.mubr.bf16.mxu0 %v1616_v4 }
  0x73   : > { %1459 = vmatmul.mubr.msk.bf16.gmra.mrb[16].mxu0 %vm636_vm2, %v1556_v47 }
  0x74   : > { %743 = vmatprep.mubr.bf16.mxu0 %v1616_v4 }
  0x7b   : > { %1460 = vmatmul.mubr.msk.bf16.gmra.mrb[20].mxu0 %vm636_vm2, %v1557_v48 }
  0x7c   : > { %753 = vmatprep.mubr.bf16.mxu0 %v1616_v4 }
  0x83   : > { %1461 = vmatmul.mubr.msk.bf16.gmra.mrb[24].mxu0 %vm636_vm2, %v1558_v49 }
  0x84   : > { %763 = vmatprep.mubr.bf16.mxu0 %v1616_v4 }
  0x8b   : > { %1462 = vmatmul.mubr.msk.bf16.gmra.mrb[28].mxu0 %vm636_vm2, %v1559_v50 }
 0x126   : > { %v695_v63 = vpop.f32.mrb[0].mxu0 }
 0x127   : > { %v786_v0 = vadd.f32 %v1852_v61, %v695_v63  ;;  %v697_v1 = vpop.f32.mrb[1].mxu0 }
 0x128   : > { %v787_v2 = vadd.f32 %v1855_v62, %v697_v1  ;;  %v699_v3 = vpop.f32.mrb[2].mxu0 }
 0x129   : > { %v788_v4 = vadd.f32 %v1852_v61, %v699_v3  ;;  %v701_v5 = vpop.f32.mrb[3].mxu0  ;;  %v818_v7 = vmax.f32 %v786_v0, 0.0 }
 0x12a   : > { %v789_v6 = vadd.f32 %v1855_v62, %v701_v5  ;;  %v819_v9 = vmax.f32 %v787_v2, 0.0 }
 0x12b   : > { %v820_v8 = vmax.f32 %v788_v4, 0.0 }
 0x12c   : > { %v821_v10 = vmax.f32 %v789_v6, 0.0 }
 0x12d   : > { %v850_v11 = vpack.c.bf16 %v820_v8, %v818_v7 }
 0x12e   : > { %v705_v12 = vpop.f32.mrb[4].mxu0  ;;  %v851_v13 = vpack.c.bf16 %v821_v10, %v819_v9 }
 0x12f   : > { %v790_v14 = vadd.f32 %v1852_v61, %v705_v12  ;;  %v707_v15 = vpop.f32.mrb[5].mxu0 }
 0x130   : > { %v791_v16 = vadd.f32 %v1855_v62, %v707_v15  ;;  %v709_v17 = vpop.f32.mrb[6].mxu0  ;;  %1102 = vmatprep.mubr.bf16.mxu1 %v851_v13 }
 0x131   : > { %v792_v18 = vadd.f32 %v1852_v61, %v709_v17  ;;  %v711_v19 = vpop.f32.mrb[7].mxu0  ;;  %1103 = vmatmul.mubr.bf16.vlgmr.msra.gmra.mrb[0].mxu1 %v850_v11  ;;  %v822_v21 = vmax.f32 %v790_v14, 0.0 }
 0x132   : > { %v793_v20 = vadd.f32 %v1855_v62, %v711_v19  ;;  %v823_v23 = vmax.f32 %v791_v16, 0.0 }
 0x133   : > { %v824_v22 = vmax.f32 %v792_v18, 0.0 }
 0x134   : > { %v825_v24 = vmax.f32 %v793_v20, 0.0 }
 0x135   : > { %v852_v25 = vpack.c.bf16 %v824_v22, %v822_v21 }
 0x136   : > { %v853_v26 = vpack.c.bf16 %v825_v24, %v823_v23  ;;  %v715_v27 = vpop.f32.mrb[8].mxu0 }
 0x137   : > { %v794_v28 = vadd.f32 %v1852_v61, %v715_v27  ;;  %v717_v29 = vpop.f32.mrb[9].mxu0 }
 0x138   : > { %v795_v30 = vadd.f32 %v1855_v62, %v717_v29  ;;  %v719_v31 = vpop.f32.mrb[10].mxu0  ;;  %1112 = vmatprep.mubr.bf16.mxu1 %v853_v26 }
 0x139   : > { %v796_v32 = vadd.f32 %v1852_v61, %v719_v31  ;;  %v721_v33 = vpop.f32.mrb[11].mxu0  ;;  %1113 = vmatmul.mubr.bf16.gmra.mrb[4].mxu1 %v852_v25  ;;  %v826_v35 = vmax.f32 %v794_v28, 0.0 }
 0x13a   : > { %v797_v34 = vadd.f32 %v1855_v62, %v721_v33  ;;  %v827_v37 = vmax.f32 %v795_v30, 0.0 }
 0x13b   : > { %v828_v36 = vmax.f32 %v796_v32, 0.0 }
 0x13c   : > { %v829_v38 = vmax.f32 %v797_v34, 0.0 }
 0x13d   : > { %v854_v39 = vpack.c.bf16 %v828_v36, %v826_v35 }
 0x13e   : > { %v855_v40 = vpack.c.bf16 %v829_v38, %v827_v37  ;;  %v725_v41 = vpop.f32.mrb[12].mxu0 }
 0x13f   : > { %v798_v42 = vadd.f32 %v1852_v61, %v725_v41  ;;  %v727_v43 = vpop.f32.mrb[13].mxu0 }
 0x140   : > { %v799_v44 = vadd.f32 %v1855_v62, %v727_v43  ;;  %v729_v45 = vpop.f32.mrb[14].mxu0  ;;  %1122 = vmatprep.mubr.bf16.mxu1 %v855_v40 }
 0x141   : > { %v800_v46 = vadd.f32 %v1852_v61, %v729_v45  ;;  %v731_v47 = vpop.f32.mrb[15].mxu0  ;;  %1123 = vmatmul.mubr.bf16.gmra.mrb[8].mxu1 %v854_v39  ;;  %v830_v49 = vmax.f32 %v798_v42, 0.0 }
 0x142   : > { %v801_v48 = vadd.f32 %v1855_v62, %v731_v47  ;;  %v831_v51 = vmax.f32 %v799_v44, 0.0 }
 0x143   : > { %v832_v50 = vmax.f32 %v800_v46, 0.0 }
 0x144   : > { %v833_v52 = vmax.f32 %v801_v48, 0.0 }
 0x145   : > { %v856_v53 = vpack.c.bf16 %v832_v50, %v830_v49 }
 0x146   : > { %v857_v54 = vpack.c.bf16 %v833_v52, %v831_v51  ;;  %v735_v55 = vpop.f32.mrb[16].mxu0  ;;  %v898_v51 = vld [vmem:[%s2018_s6] sm:$0x3] }
 0x147   : > { %v802_v56 = vadd.f32 %v1852_v61, %v735_v55  ;;  %v737_v57 = vpop.f32.mrb[17].mxu0  ;;  %v1893_v52 = vrot.slane %v898_v51, %v1844_v58 }
 0x148   : > { %v803_v59 = vadd.f32 %v1855_v62, %v737_v57  ;;  %v739_v63 = vpop.f32.mrb[18].mxu0  ;;  %1132 = vmatprep.mubr.bf16.mxu1 %v857_v54 }
 0x149   : > { %v804_v0 = vadd.f32 %v1852_v61, %v739_v63  ;;  %v741_v1 = vpop.f32.mrb[19].mxu0  ;;  %1133 = vmatmul.mubr.bf16.gmra.mrb[12].mxu1 %v856_v53  ;;  %v834_v3 = vmax.f32 %v802_v56, 0.0 }
 0x14a   : > { %v805_v2 = vadd.f32 %v1855_v62, %v741_v1  ;;  %v835_v5 = vmax.f32 %v803_v59, 0.0 }
 0x14b   : > { %v836_v4 = vmax.f32 %v804_v0, 0.0 }
 0x14c   : > { %v837_v6 = vmax.f32 %v805_v2, 0.0 }
 0x14d   : > { %v858_v7 = vpack.c.bf16 %v836_v4, %v834_v3 }
 0x14e   : > { %v859_v8 = vpack.c.bf16 %v837_v6, %v835_v5  ;;  %v745_v9 = vpop.f32.mrb[20].mxu0 }
 0x14f   : > { %v806_v10 = vadd.f32 %v1852_v61, %v745_v9  ;;  %v747_v11 = vpop.f32.mrb[21].mxu0 }
 0x150   : > { %v807_v12 = vadd.f32 %v1855_v62, %v747_v11  ;;  %v749_v13 = vpop.f32.mrb[22].mxu0  ;;  %1142 = vmatprep.mubr.bf16.mxu1 %v859_v8 }
 0x151   : > { %v808_v14 = vadd.f32 %v1852_v61, %v749_v13  ;;  %v751_v15 = vpop.f32.mrb[23].mxu0  ;;  %1143 = vmatmul.mubr.bf16.gmra.mrb[16].mxu1 %v858_v7  ;;  %v838_v17 = vmax.f32 %v806_v10, 0.0 }
 0x152   : > { %v809_v16 = vadd.f32 %v1855_v62, %v751_v15  ;;  %v839_v19 = vmax.f32 %v807_v12, 0.0 }
 0x153   : > { %v840_v18 = vmax.f32 %v808_v14, 0.0 }
 0x154   : > { %v841_v20 = vmax.f32 %v809_v16, 0.0 }
 0x155   : > { %v860_v21 = vpack.c.bf16 %v840_v18, %v838_v17 }
 0x156   : > { %v861_v22 = vpack.c.bf16 %v841_v20, %v839_v19  ;;  %v755_v23 = vpop.f32.mrb[24].mxu0 }
 0x157   : > { %v810_v24 = vadd.f32 %v1852_v61, %v755_v23  ;;  %v757_v25 = vpop.f32.mrb[25].mxu0 }
 0x158   : > { %v811_v26 = vadd.f32 %v1855_v62, %v757_v25  ;;  %v759_v27 = vpop.f32.mrb[26].mxu0  ;;  %1152 = vmatprep.mubr.bf16.mxu1 %v861_v22 }
 0x159   : > { %v812_v28 = vadd.f32 %v1852_v61, %v759_v27  ;;  %v761_v29 = vpop.f32.mrb[27].mxu0  ;;  %1153 = vmatmul.mubr.bf16.gmra.mrb[20].mxu1 %v860_v21  ;;  %v842_v31 = vmax.f32 %v810_v24, 0.0 }
 0x15a   : > { %v813_v30 = vadd.f32 %v1855_v62, %v761_v29  ;;  %v843_v33 = vmax.f32 %v811_v26, 0.0 }
 0x15b   : > { %v844_v32 = vmax.f32 %v812_v28, 0.0 }
 0x15c   : > { %v845_v34 = vmax.f32 %v813_v30, 0.0 }
 0x15d   : > { %v862_v35 = vpack.c.bf16 %v844_v32, %v842_v31 }
 0x15e   : > { %v863_v36 = vpack.c.bf16 %v845_v34, %v843_v33  ;;  %v765_v37 = vpop.f32.mrb[28].mxu0 }
 0x15f   : > { %v814_v38 = vadd.f32 %v1852_v61, %v765_v37  ;;  %v767_v39 = vpop.f32.mrb[29].mxu0 }
 0x160   : > { %v815_v40 = vadd.f32 %v1855_v62, %v767_v39  ;;  %v769_v41 = vpop.f32.mrb[30].mxu0  ;;  %1162 = vmatprep.mubr.bf16.mxu1 %v863_v36 }
 0x161   : > { %v816_v42 = vadd.f32 %v1852_v61, %v769_v41  ;;  %v771_v43 = vpop.f32.mrb[31].mxu0  ;;  %1163 = vmatmul.mubr.bf16.gmra.mrb[24].mxu1 %v862_v35  ;;  %v846_v45 = vmax.f32 %v814_v38, 0.0  ;;  %v1896_v61 = vrot.slane %v898_v51, %v1849_v60 }
 0x162   : > { %v817_v44 = vadd.f32 %v1855_v62, %v771_v43  ;;  %v847_v47 = vmax.f32 %v815_v40, 0.0  ;;  %v1215_v62 = vld [vmem:[%s2019_s7] sm:$0x3] }
 0x163   : > { %v848_v46 = vmax.f32 %v816_v42, 0.0  ;;  %v1903_v56 = vrot.slane %v1215_v62, %v1844_v58  ;;  %v1907_v63 = vrot.slane %v1215_v62, %v1849_v60 }
 0x164   : > { %v849_v48 = vmax.f32 %v817_v44, 0.0 }
 0x165   : > { %v864_v49 = vpack.c.bf16 %v848_v46, %v846_v45 }
 0x166   : > { %v865_v50 = vpack.c.bf16 %v849_v48, %v847_v47 }
 0x168   : > { %1172 = vmatprep.mubr.bf16.mxu1 %v865_v50 }
 0x169   : > { %1173 = vmatmul.mubr.bf16.gmra.mrb[28].mxu1 %v864_v49 }
 0x204   : > { %v1104_v53 = vpop.f32.mrb[0].mxu1 }
 0x205   : > { %v1105_v54 = vadd.f32 %v1104_v53, %v1893_v52  ;;  %v1106_v55 = vpop.f32.mrb[1].mxu1 }
 0x206   : > { %v1107_v57 = vadd.f32 %v1106_v55, %v1896_v61  ;;  %v1108_v59 = vpop.f32.mrb[2].mxu1 }
 0x207   : > { %v1183_v0 = vmax.f32 %v1105_v54, 0.0  ;;  %v1109_v1 = vadd.f32 %v1108_v59, %v1893_v52  ;;  %v1110_v2 = vpop.f32.mrb[3].mxu1 }
 0x208   : > { %v1184_v3 = vmax.f32 %v1107_v57, 0.0  ;;  %v1111_v4 = vadd.f32 %v1110_v2, %v1896_v61 }
 0x209   : > { %v1185_v5 = vmax.f32 %v1109_v1, 0.0  ;;  %v1227_v6 = vmul.f32 %v1903_v56, %v1183_v0 }
 0x20a   : > { %v1186_v7 = vmax.f32 %v1111_v4, 0.0  ;;  %v1228_v58 = vmul.f32 %v1907_v63, %v1184_v3 }
 0x20b   : > { %v1229_v8 = vmul.f32 %v1903_v56, %v1185_v5 }
 0x20c   : > { %v1230_v9 = vmul.f32 %v1907_v63, %v1186_v7  ;;  %v1114_v10 = vpop.f32.mrb[4].mxu1  ;;  %v1259_v60 = vadd.f32 %v1228_v58, %v1227_v6 }
 0x20d   : > { %v1115_v11 = vadd.f32 %v1114_v10, %v1893_v52  ;;  %v1116_v12 = vpop.f32.mrb[5].mxu1 }
 0x20e   : > { %v1117_v13 = vadd.f32 %v1116_v12, %v1896_v61  ;;  %1260 = vadd.xlane.f32.xlu0 %v1259_v60  ;;  %v1118_v14 = vpop.f32.mrb[6].mxu1  ;;  %v1262_v15 = vadd.f32 %v1230_v9, %v1229_v8 }
 0x20f   : > { %v1187_v16 = vmax.f32 %v1115_v11, 0.0  ;;  %v1119_v17 = vadd.f32 %v1118_v14, %v1893_v52  ;;  %v1120_v18 = vpop.f32.mrb[7].mxu1 }
 0x210   : > { %v1188_v19 = vmax.f32 %v1117_v13, 0.0  ;;  %v1121_v20 = vadd.f32 %v1120_v18, %v1896_v61 }
 0x211   : > { %v1189_v21 = vmax.f32 %v1119_v17, 0.0  ;;  %v1231_v22 = vmul.f32 %v1903_v56, %v1187_v16 }
 0x212   : > { %v1190_v23 = vmax.f32 %v1121_v20, 0.0  ;;  %1263 = vadd.xlane.f32.xlu0 %v1262_v15  ;;  %v1232_v24 = vmul.f32 %v1907_v63, %v1188_v19 }
 0x213   : > { %v1233_v25 = vmul.f32 %v1903_v56, %v1189_v21 }
 0x214   : > { %v1234_v26 = vmul.f32 %v1907_v63, %v1190_v23  ;;  %v1124_v27 = vpop.f32.mrb[8].mxu1  ;;  %v1265_v28 = vadd.f32 %v1232_v24, %v1231_v22 }
 0x215   : > { %v1125_v29 = vadd.f32 %v1124_v27, %v1893_v52  ;;  %v1126_v30 = vpop.f32.mrb[9].mxu1 }
 0x216   : > { %v1127_v31 = vadd.f32 %v1126_v30, %v1896_v61  ;;  %1266 = vadd.xlane.f32.xlu1 %v1265_v28  ;;  %v1128_v32 = vpop.f32.mrb[10].mxu1  ;;  %v1268_v33 = vadd.f32 %v1234_v26, %v1233_v25 }
 0x217   : > { %v1191_v34 = vmax.f32 %v1125_v29, 0.0  ;;  %v1129_v35 = vadd.f32 %v1128_v32, %v1893_v52  ;;  %v1130_v36 = vpop.f32.mrb[11].mxu1 }
 0x218   : > { %v1192_v37 = vmax.f32 %v1127_v31, 0.0  ;;  %v1131_v38 = vadd.f32 %v1130_v36, %v1896_v61 }
 0x219   : > { %v1235_v39 = vmul.f32 %v1903_v56, %v1191_v34  ;;  %v1193_v40 = vmax.f32 %v1129_v35, 0.0 }
 0x21a   : > { %v1236_v41 = vmul.f32 %v1907_v63, %v1192_v37  ;;  %v1194_v42 = vmax.f32 %v1131_v38, 0.0  ;;  %1269 = vadd.xlane.f32.xlu1 %v1268_v33 }
 0x21b   : > { %v1237_v43 = vmul.f32 %v1903_v56, %v1193_v40 }
 0x21c   : > { %v1238_v44 = vmul.f32 %v1907_v63, %v1194_v42  ;;  %v1134_v45 = vpop.f32.mrb[12].mxu1  ;;  %v1271_v46 = vadd.f32 %v1236_v41, %v1235_v39 }
 0x21d   : > { %v1135_v47 = vadd.f32 %v1134_v45, %v1893_v52  ;;  %v1136_v48 = vpop.f32.mrb[13].mxu1 }
 0x21e   : > { %v1137_v49 = vadd.f32 %v1136_v48, %v1896_v61  ;;  %1272 = vadd.xlane.f32.xlu0 %v1271_v46  ;;  %v1138_v50 = vpop.f32.mrb[14].mxu1  ;;  %v1274_v51 = vadd.f32 %v1238_v44, %v1237_v43 }
 0x21f   : > { %v1195_v62 = vmax.f32 %v1135_v47, 0.0  ;;  %v1139_v53 = vadd.f32 %v1138_v50, %v1893_v52  ;;  %v1140_v54 = vpop.f32.mrb[15].mxu1 }
 0x220   : > { %v1196_v55 = vmax.f32 %v1137_v49, 0.0  ;;  %v1141_v57 = vadd.f32 %v1140_v54, %v1896_v61  ;;  %1275 = vadd.xlane.f32.xlu1 %v1274_v51 }
 0x221   : > { %v1239_v59 = vmul.f32 %v1903_v56, %v1195_v62  ;;  %v1197_v0 = vmax.f32 %v1139_v53, 0.0 }
 0x222   : > { %v1240_v1 = vmul.f32 %v1907_v63, %v1196_v55  ;;  %v1198_v2 = vmax.f32 %v1141_v57, 0.0 }
 0x223   : > { %v1241_v3 = vmul.f32 %v1903_v56, %v1197_v0 }
 0x224   : > { %v1242_v4 = vmul.f32 %v1907_v63, %v1198_v2  ;;  %v1144_v5 = vpop.f32.mrb[16].mxu1  ;;  %v1277_v6 = vadd.f32 %v1240_v1, %v1239_v59 }
 0x225   : > { %v1145_v7 = vadd.f32 %v1144_v5, %v1893_v52  ;;  %v1146_v58 = vpop.f32.mrb[17].mxu1 }
 0x226   : > { %v1147_v8 = vadd.f32 %v1146_v58, %v1896_v61  ;;  %1278 = vadd.xlane.f32.xlu0 %v1277_v6  ;;  %v1148_v9 = vpop.f32.mrb[18].mxu1  ;;  %v1280_v10 = vadd.f32 %v1242_v4, %v1241_v3 }
 0x227   : > { %v1199_v60 = vmax.f32 %v1145_v7, 0.0  ;;  %v1149_v11 = vadd.f32 %v1148_v9, %v1893_v52  ;;  %v1150_v12 = vpop.f32.mrb[19].mxu1 }
 0x228   : > { %v1200_v13 = vmax.f32 %v1147_v8, 0.0  ;;  %v1151_v14 = vadd.f32 %v1150_v12, %v1896_v61  ;;  %1281 = vadd.xlane.f32.xlu1 %v1280_v10 }
 0x229   : > { %v1243_v15 = vmul.f32 %v1903_v56, %v1199_v60  ;;  %v1201_v16 = vmax.f32 %v1149_v11, 0.0 }
 0x22a   : > { %v1244_v17 = vmul.f32 %v1907_v63, %v1200_v13  ;;  %v1202_v18 = vmax.f32 %v1151_v14, 0.0 }
 0x22b   : > { %v1245_v19 = vmul.f32 %v1903_v56, %v1201_v16 }
 0x22c   : > { %v1246_v20 = vmul.f32 %v1907_v63, %v1202_v18  ;;  %v1154_v21 = vpop.f32.mrb[20].mxu1  ;;  %v1283_v22 = vadd.f32 %v1244_v17, %v1243_v15 }
 0x22d   : > { %v1155_v23 = vadd.f32 %v1154_v21, %v1893_v52  ;;  %v1156_v24 = vpop.f32.mrb[21].mxu1 }
 0x22e   : > { %v1157_v25 = vadd.f32 %v1156_v24, %v1896_v61  ;;  %1284 = vadd.xlane.f32.xlu0 %v1283_v22  ;;  %v1158_v26 = vpop.f32.mrb[22].mxu1  ;;  %v1286_v27 = vadd.f32 %v1246_v20, %v1245_v19 }
 0x22f   : > { %v1203_v28 = vmax.f32 %v1155_v23, 0.0  ;;  %v1159_v29 = vadd.f32 %v1158_v26, %v1893_v52  ;;  %v1160_v30 = vpop.f32.mrb[23].mxu1 }
 0x230   : > { %v1204_v31 = vmax.f32 %v1157_v25, 0.0  ;;  %v1161_v32 = vadd.f32 %v1160_v30, %v1896_v61  ;;  %1287 = vadd.xlane.f32.xlu1 %v1286_v27 }
 0x231   : > { %v1247_v33 = vmul.f32 %v1903_v56, %v1203_v28  ;;  %v1205_v34 = vmax.f32 %v1159_v29, 0.0 }
 0x232   : > { %v1248_v35 = vmul.f32 %v1907_v63, %v1204_v31  ;;  %v1206_v36 = vmax.f32 %v1161_v32, 0.0 }
 0x233   : > { %v1249_v37 = vmul.f32 %v1903_v56, %v1205_v34 }
 0x234   : > { %v1250_v38 = vmul.f32 %v1907_v63, %v1206_v36  ;;  %v1164_v39 = vpop.f32.mrb[24].mxu1  ;;  %v1289_v40 = vadd.f32 %v1248_v35, %v1247_v33 }
 0x235   : > { %v1165_v41 = vadd.f32 %v1164_v39, %v1893_v52  ;;  %v1166_v42 = vpop.f32.mrb[25].mxu1 }
 0x236   : > { %v1167_v43 = vadd.f32 %v1166_v42, %v1896_v61  ;;  %1290 = vadd.xlane.f32.xlu0 %v1289_v40  ;;  %v1168_v44 = vpop.f32.mrb[26].mxu1  ;;  %v1292_v45 = vadd.f32 %v1250_v38, %v1249_v37 }
 0x237   : > { %v1207_v46 = vmax.f32 %v1165_v41, 0.0  ;;  %v1169_v47 = vadd.f32 %v1168_v44, %v1893_v52  ;;  %v1170_v48 = vpop.f32.mrb[27].mxu1 }
 0x238   : > { %v1208_v49 = vmax.f32 %v1167_v43, 0.0  ;;  %v1171_v50 = vadd.f32 %v1170_v48, %v1896_v61  ;;  %1293 = vadd.xlane.f32.xlu1 %v1292_v45 }
 0x239   : > { %v1251_v51 = vmul.f32 %v1903_v56, %v1207_v46  ;;  %v1209_v62 = vmax.f32 %v1169_v47, 0.0 }
 0x23a   : > { %v1252_v53 = vmul.f32 %v1907_v63, %v1208_v49  ;;  %v1210_v54 = vmax.f32 %v1171_v50, 0.0 }
 0x23b   : > { %v1253_v55 = vmul.f32 %v1903_v56, %v1209_v62 }
 0x23c   : > { %v1254_v57 = vmul.f32 %v1907_v63, %v1210_v54  ;;  %v1174_v59 = vpop.f32.mrb[28].mxu1  ;;  %v1295_v0 = vadd.f32 %v1252_v53, %v1251_v51 }
 0x23d   : > { %v1175_v1 = vadd.f32 %v1174_v59, %v1893_v52  ;;  %v1176_v2 = vpop.f32.mrb[29].mxu1 }
 0x23e   : > { %v1177_v3 = vadd.f32 %v1176_v2, %v1896_v61  ;;  %1296 = vadd.xlane.f32.xlu0 %v1295_v0  ;;  %v1178_v4 = vpop.f32.mrb[30].mxu1  ;;  %v1298_v5 = vadd.f32 %v1254_v57, %v1253_v55 }
 0x23f   : > { %v1211_v6 = vmax.f32 %v1175_v1, 0.0  ;;  %v1179_v7 = vadd.f32 %v1178_v4, %v1893_v52  ;;  %v1180_v58 = vpop.f32.mrb[31].mxu1  ;;  %v1495_v52 = vld [vmem:[#allocation2] ss:$0 sm:$0xff] }
 0x240   : > { %v1212_v8 = vmax.f32 %v1177_v3, 0.0  ;;  %v1181_v9 = vadd.f32 %v1180_v58, %v1896_v61  ;;  %1299 = vadd.xlane.f32.xlu1 %v1298_v5 }
 0x241   : > { %v1255_v10 = vmul.f32 %v1903_v56, %v1211_v6  ;;  %v1213_v60 = vmax.f32 %v1179_v7, 0.0 }
 0x242   : > { %v1256_v11 = vmul.f32 %v1907_v63, %v1212_v8  ;;  %v1214_v12 = vmax.f32 %v1181_v9, 0.0 }
 0x243   : > { %v1257_v13 = vmul.f32 %v1903_v56, %v1213_v60 }
 0x244   : > { %v1258_v14 = vmul.f32 %v1907_v63, %v1214_v12  ;;  %v1301_v15 = vadd.f32 %v1256_v11, %v1255_v10 }
 0x246   : > { %1302 = vadd.xlane.f32.xlu0 %v1301_v15  ;;  %v1304_v16 = vadd.f32 %v1258_v14, %v1257_v13 }
 0x248   : > { %1305 = vadd.xlane.f32.xlu1 %v1304_v16 }
 0x29b   : > { %v1261_v61 = vpop.xlane.xlu0 %1260 }
 0x29c   : > { %v1314_v56 = vadd.f32 %v1495_v52, %v1261_v61 }
 0x29e   : > { %1331 = vst.msk [vmem:[%s1975_s23] sm:$0xff] %vm1330_vm3, %v1314_v56 }
 0x29f   : > { %v1264_v63 = vpop.xlane.xlu0 %1263 }
 0x2a0   : > { %v1315_v17 = vadd.f32 %v1495_v52, %v1264_v63 }
 0x2a2   : > { %1332 = vst.msk [vmem:[%s1975_s23 + $0x8] sm:$0xff] %vm1330_vm3, %v1315_v17 }
 0x2a3   : > { %v1267_v18 = vpop.xlane.xlu1 %1266 }
 0x2a4   : > { %v1316_v19 = vadd.f32 %v1495_v52, %v1267_v18 }
 0x2a6   : > { %1333 = vst.msk [vmem:[%s1975_s23 + $0x10] sm:$0xff] %vm1330_vm3, %v1316_v19 }
 0x2a7   : > { %v1270_v20 = vpop.xlane.xlu1 %1269 }
 0x2a8   : > { %v1317_v21 = vadd.f32 %v1495_v52, %v1270_v20 }
 0x2aa   : > { %1334 = vst.msk [vmem:[%s1975_s23 + $0x18] sm:$0xff] %vm1330_vm3, %v1317_v21 }
 0x2ab   : > { %v1273_v22 = vpop.xlane.xlu0 %1272 }
 0x2ac   : > { %v1318_v23 = vadd.f32 %v1495_v52, %v1273_v22 }
 0x2ad   : > { %v1276_v24 = vpop.xlane.xlu1 %1275 }
 0x2ae   : > { %1335 = vst.msk [vmem:[%s1975_s23 + $0x20] sm:$0xff] %vm1330_vm3, %v1318_v23  ;;  %v1319_v25 = vadd.f32 %v1495_v52, %v1276_v24 }
 0x2b0   : > { %1336 = vst.msk [vmem:[%s1975_s23 + $0x28] sm:$0xff] %vm1330_vm3, %v1319_v25 }
 0x2b3   : > { %v1279_v26 = vpop.xlane.xlu0 %1278 }
 0x2b4   : > { %v1320_v27 = vadd.f32 %v1495_v52, %v1279_v26 }
 0x2b5   : > { %v1282_v28 = vpop.xlane.xlu1 %1281 }
 0x2b6   : > { %1337 = vst.msk [vmem:[%s1975_s23 + $0x30] sm:$0xff] %vm1330_vm3, %v1320_v27  ;;  %v1321_v29 = vadd.f32 %v1495_v52, %v1282_v28 }
 0x2b8   : > { %1338 = vst.msk [vmem:[%s1975_s23 + $0x38] sm:$0xff] %vm1330_vm3, %v1321_v29 }
 0x2bb   : > { %v1285_v30 = vpop.xlane.xlu0 %1284 }
 0x2bc   : > { %v1322_v31 = vadd.f32 %v1495_v52, %v1285_v30 }
 0x2bd   : > { %v1288_v32 = vpop.xlane.xlu1 %1287 }
 0x2be   : > { %1339 = vst.msk [vmem:[%s1975_s23 + $0x40] sm:$0xff] %vm1330_vm3, %v1322_v31  ;;  %v1323_v33 = vadd.f32 %v1495_v52, %v1288_v32 }
 0x2c0   : > { %1340 = vst.msk [vmem:[%s1975_s23 + $0x48] sm:$0xff] %vm1330_vm3, %v1323_v33 }
 0x2c3   : > { %v1291_v34 = vpop.xlane.xlu0 %1290 }
 0x2c4   : > { %v1324_v35 = vadd.f32 %v1495_v52, %v1291_v34 }
 0x2c5   : > { %v1294_v36 = vpop.xlane.xlu1 %1293 }
 0x2c6   : > { %1341 = vst.msk [vmem:[%s1975_s23 + $0x50] sm:$0xff] %vm1330_vm3, %v1324_v35  ;;  %v1325_v37 = vadd.f32 %v1495_v52, %v1294_v36 }
 0x2c8   : > { %1342 = vst.msk [vmem:[%s1975_s23 + $0x58] sm:$0xff] %vm1330_vm3, %v1325_v37 }
 0x2cb   : > { %v1297_v38 = vpop.xlane.xlu0 %1296 }
 0x2cc   : > { %v1326_v39 = vadd.f32 %v1495_v52, %v1297_v38 }
 0x2cd   : > { %v1300_v40 = vpop.xlane.xlu1 %1299 }
 0x2ce   : > { %1343 = vst.msk [vmem:[%s1975_s23 + $0x60] sm:$0xff] %vm1330_vm3, %v1326_v39  ;;  %v1327_v41 = vadd.f32 %v1495_v52, %v1300_v40 }
 0x2d0   : > { %1344 = vst.msk [vmem:[%s1975_s23 + $0x68] sm:$0xff] %vm1330_vm3, %v1327_v41 }
 0x2d3   : > { %v1303_v42 = vpop.xlane.xlu0 %1302 }
 0x2d4   : > { %v1328_v43 = vadd.f32 %v1495_v52, %v1303_v42 }
 0x2d5   : > { %v1306_v44 = vpop.xlane.xlu1 %1305 }
 0x2d6   : > { %1345 = vst.msk [vmem:[%s1975_s23 + $0x70] sm:$0xff] %vm1330_vm3, %v1328_v43  ;;  %v1329_v45 = vadd.f32 %v1495_v52, %v1306_v44 }
 0x2d8   : > { %1346 = vst.msk [vmem:[%s1975_s23 + $0x78] sm:$0xff] %vm1330_vm3, %v1329_v45 }
 0x2d9 PF: > { %s21_s11 = sadd.s32 1, %s1614_s11  }
 0x2da   : > { %p18_p4 = scmp.ge.s32.totalorder %s21_s11, 4  }
 0x2dc   :  { %20 = sbr.rel (!%p18_p4) target bundleno = 3 (0x3), region = 89 }

</bundles_post_ra>
